<compile_context>
chip_gen: v7x
topology: tpu7x:2x2x1
jax: 0.10.0
libtpu: 0.0.40
codegen_flags: <defaults>
</compile_context>

<pallas_src>
import functools

import jax
import jax.numpy as jnp
from jax.experimental import pallas as pl
from jax.experimental.pallas import tpu as pltpu

LOG_STD_MIN = -20.0
LOG_STD_MAX = 2.0


def _round_up(x, m):
    return ((x + m - 1) // m) * m


def _policy_kernel(x_ref, w1_ref, b1_ref, w2_ref, b2_ref,
                   wm_ref, bm_ref, ws_ref, bs_ref,
                   mean_ref, logstd_ref):
    cdt = w1_ref.dtype  # compute dtype of the matmul operands (f32 or bf16)

    # in-kernel cast: cheap VPU pack hidden under the input DMA
    x = x_ref[...].astype(cdt)

    # hidden layer 1: Linear + ReLU (f32 accumulation, f32 elementwise)
    h1 = jnp.dot(x, w1_ref[...], preferred_element_type=jnp.float32) + b1_ref[...]
    h1 = jnp.maximum(h1, 0.0)

    # hidden layer 2: Linear + ReLU
    h2 = jnp.dot(h1.astype(cdt), w2_ref[...],
                 preferred_element_type=jnp.float32) + b2_ref[...]
    h2 = jnp.maximum(h2, 0.0)
    h2c = h2.astype(cdt)

    # heads: two narrow (tb, A) results stored directly (no 128-wide slab)
    mean = jnp.dot(h2c, wm_ref[...], preferred_element_type=jnp.float32) + bm_ref[...]
    log_std = jnp.dot(h2c, ws_ref[...], preferred_element_type=jnp.float32) + bs_ref[...]

    mean_ref[...] = mean
    logstd_ref[...] = jnp.clip(log_std, LOG_STD_MIN, LOG_STD_MAX)


def _pick_batch_tile(batch, block_b):
    """Batch tile: full array for tiny batches, otherwise a multiple of 8
    chosen so the grid has >=2 blocks (both v7x TensorCores get work),
    capped at block_b (v6e/v5e overhead amortization)."""
    if batch <= 8:
        return batch
    tb = min(block_b, _round_up(pl.cdiv(batch, 2), 8))
    return max(tb, 8)


@functools.partial(jax.jit, static_argnames=("block_b",))
def policy_forward(state, packed, *, block_b=1024):
    """SAC policy forward as one Pallas kernel.

    state:  (B, state_dim) float32 (NOT pre-cast / pre-padded by the wrapper)
    packed: dict from pack_params() - w1 (S,Hp), b1 (1,Hp), w2 (Hp,Hp),
            b2 (1,Hp), wm (Hp,A), bm (1,A), ws (Hp,A), bs (1,A)
    returns (mean, log_std), each (B, action_dim) float32
    """
    B, S = state.shape
    A = packed["wm"].shape[1]

    tb = _pick_batch_tile(B, block_b)
    grid = (pl.cdiv(B, tb),)          # ragged last tile: Pallas masks its store

    resident = lambda i: (0, 0)       # weights/biases: same block every step

    mean, log_std = pl.pallas_call(
        _policy_kernel,
        out_shape=(jax.ShapeDtypeStruct((B, A), jnp.float32),
                   jax.ShapeDtypeStruct((B, A), jnp.float32)),
        grid=grid,
        in_specs=[
            pl.BlockSpec((tb, S), lambda i: (i, 0)),            # state tile
            pl.BlockSpec(packed["w1"].shape, resident),
            pl.BlockSpec(packed["b1"].shape, resident),
            pl.BlockSpec(packed["w2"].shape, resident),
            pl.BlockSpec(packed["b2"].shape, resident),
            pl.BlockSpec(packed["wm"].shape, resident),
            pl.BlockSpec(packed["bm"].shape, resident),
            pl.BlockSpec(packed["ws"].shape, resident),
            pl.BlockSpec(packed["bs"].shape, resident),
        ],
        out_specs=(pl.BlockSpec((tb, A), lambda i: (i, 0)),
                   pl.BlockSpec((tb, A), lambda i: (i, 0))),
        compiler_params=pltpu.CompilerParams(
            dimension_semantics=("parallel",),   # shard batch tiles across TCs
        ),
    )(state, packed["w1"], packed["b1"], packed["w2"], packed["b2"],
      packed["wm"], packed["bm"], packed["ws"], packed["bs"])

    return mean, log_std


def init_policy_params(key, state_dim, hidden_dim, action_dim, init_w=3e-3):
    """Float32 parameters mirroring the PyTorch PolicyNetwork init:
    default nn.Linear U(-1/sqrt(fan_in), 1/sqrt(fan_in)) for hidden layers,
    U(-init_w, init_w) for the mean/log_std heads. Stored as (in, out)."""
    ks = jax.random.split(key, 8)

    def u(k, shape, bound):
        return jax.random.uniform(k, shape, jnp.float32, -bound, bound)

    b1 = 1.0 / jnp.sqrt(state_dim)
    b2 = 1.0 / jnp.sqrt(hidden_dim)
    return {
        "w1": u(ks[0], (state_dim, hidden_dim), b1),
        "b1": u(ks[1], (1, hidden_dim), b1),
        "w2": u(ks[2], (hidden_dim, hidden_dim), b2),
        "b2": u(ks[3], (1, hidden_dim), b2),
        "wm": u(ks[4], (hidden_dim, action_dim), init_w),
        "bm": u(ks[5], (1, action_dim), init_w),
        "ws": u(ks[6], (hidden_dim, action_dim), init_w),
        "bs": u(ks[7], (1, action_dim), init_w),
    }


def pack_params(params, *, compute_dtype=jnp.bfloat16, pad_hidden_to=128):
    """Pack for the kernel: zero-pad the hidden dim to a lane-dense multiple
    of `pad_hidden_to` (exact — pads are zeros), cast matmul operands to
    `compute_dtype` (bf16 default: required for v5e's bf16-native MXU and
    halves weight DMA), keep biases f32 so elementwise math stays f32."""
    H = params["w1"].shape[1]
    Hp = _round_up(H, pad_hidden_to) if pad_hidden_to else H

    pad_cols = lambda w: jnp.pad(w, ((0, 0), (0, Hp - w.shape[1])))
    pad_rows = lambda w: jnp.pad(w, ((0, Hp - w.shape[0]), (0, 0)))

    return {
        "w1": pad_cols(params["w1"]).astype(compute_dtype),            # (S, Hp)
        "b1": pad_cols(params["b1"]).astype(jnp.float32),              # (1, Hp)
        "w2": pad_cols(pad_rows(params["w2"])).astype(compute_dtype),  # (Hp, Hp)
        "b2": pad_cols(params["b2"]).astype(jnp.float32),              # (1, Hp)
        "wm": pad_rows(params["wm"]).astype(compute_dtype),            # (Hp, A)
        "bm": params["bm"].astype(jnp.float32),                        # (1, A)
        "ws": pad_rows(params["ws"]).astype(compute_dtype),            # (Hp, A)
        "bs": params["bs"].astype(jnp.float32),                        # (1, A)
    }


def _reference_forward(state, p, compute_dtype=jnp.float32):
    """Pure-JAX reference of the same math (optionally with bf16 operands)."""
    cast = lambda a: a.astype(compute_dtype)
    h1 = jnp.maximum(
        jnp.dot(cast(state), cast(p["w1"]), preferred_element_type=jnp.float32)
        + p["b1"], 0.0)
    h2 = jnp.maximum(
        jnp.dot(cast(h1), cast(p["w2"]), preferred_element_type=jnp.float32)
        + p["b2"], 0.0)
    mean = jnp.dot(cast(h2), cast(p["wm"]),
                   preferred_element_type=jnp.float32) + p["bm"]
    log_std = jnp.clip(
        jnp.dot(cast(h2), cast(p["ws"]), preferred_element_type=jnp.float32)
        + p["bs"], LOG_STD_MIN, LOG_STD_MAX)
    return mean, log_std


if __name__ == "__main__":
    # Small shapes consistent with the SAC policy network.
    batch, state_dim, hidden_dim, action_dim = 8, 24, 32, 4

    key = jax.random.PRNGKey(0)
    k_params, k_state, k_big, k_tiny = jax.random.split(key, 4)

    params = init_policy_params(k_params, state_dim, hidden_dim, action_dim)
    state = jax.random.normal(k_state, (batch, state_dim), jnp.float32)

    # --- f32 compute path: matches the PyTorch reference math ---
    packed_f32 = pack_params(params, compute_dtype=jnp.float32)
    mean32, logstd32 = policy_forward(state, packed_f32)
    jax.block_until_ready((mean32, logstd32))

    ref_mean, ref_log_std = _reference_forward(state, params, jnp.float32)
    assert mean32.shape == (batch, action_dim)
    assert logstd32.shape == (batch, action_dim)
    assert jnp.allclose(mean32, ref_mean, atol=1e-5, rtol=1e-5)
    assert jnp.allclose(logstd32, ref_log_std, atol=1e-5, rtol=1e-5)

    # --- bf16 operand path (default packing; f32 accumulation + elementwise) ---
    packed_bf16 = pack_params(params, compute_dtype=jnp.bfloat16)
    mean16, logstd16 = policy_forward(state, packed_bf16)
    jax.block_until_ready((mean16, logstd16))

    ref_mean_bf, ref_logstd_bf = _reference_forward(state, params, jnp.bfloat16)
    assert jnp.allclose(mean16, ref_mean_bf, atol=1e-4, rtol=1e-4)
    assert jnp.allclose(logstd16, ref_logstd_bf, atol=1e-4, rtol=1e-4)
    # coarse check against the full-f32 reference (bf16 operand rounding only)
    assert jnp.allclose(mean16, ref_mean, atol=1e-2, rtol=1e-2)

    # --- larger, non-tile-multiple batch exercises the multi-block grid plus
    #     the ragged last tile (masked output store, no wrapper pad) ---
    big_state = jax.random.normal(k_big, (1000, state_dim), jnp.float32)
    mean_big, logstd_big = policy_forward(big_state, packed_f32)
    jax.block_until_ready((mean_big, logstd_big))
    ref_mean_big, ref_logstd_big = _reference_forward(big_state, params, jnp.float32)
    assert mean_big.shape == (1000, action_dim)
    assert jnp.allclose(mean_big, ref_mean_big, atol=1e-5, rtol=1e-5)
    assert jnp.allclose(logstd_big, ref_logstd_big, atol=1e-5, rtol=1e-5)

    # --- tiny actor-step batch (B < 8): single full-array tile path ---
    tiny_state = jax.random.normal(k_tiny, (3, state_dim), jnp.float32)
    mean_t, logstd_t = policy_forward(tiny_state, packed_f32)
    jax.block_until_ready((mean_t, logstd_t))
    ref_mean_t, ref_logstd_t = _reference_forward(tiny_state, params, jnp.float32)
    assert jnp.allclose(mean_t, ref_mean_t, atol=1e-5, rtol=1e-5)
    assert jnp.allclose(logstd_t, ref_logstd_t, atol=1e-5, rtol=1e-5)

    # TODO(synk): update()/train() (optimizers, replay buffer, target-network
    # soft updates, alpha tuning) are host-side training logic, not forward().
    # TODO(synk): for the tiny persistent-actor batch path, keep the ~30 KB of
    # weights VMEM-resident across calls (cross-pallas_call prefetch, P10) and
    # fuse the tanh-squash / reparameterized sampling into this kernel to cut
    # launch + weight-DMA latency.
    print("KERNEL_OK")
</pallas_src>

<mosaic_0001>
module attributes {stable_mosaic.version = 11 : i64} {
  func.func @_policy_kernel(%arg0: i32, %arg1: memref<8x24xf32, #tpu.memory_space<vmem>>, %arg2: memref<24x128xf32, #tpu.memory_space<vmem>>, %arg3: memref<1x128xf32, #tpu.memory_space<vmem>>, %arg4: memref<128x128xf32, #tpu.memory_space<vmem>>, %arg5: memref<1x128xf32, #tpu.memory_space<vmem>>, %arg6: memref<128x4xf32, #tpu.memory_space<vmem>>, %arg7: memref<1x4xf32, #tpu.memory_space<vmem>>, %arg8: memref<128x4xf32, #tpu.memory_space<vmem>>, %arg9: memref<1x4xf32, #tpu.memory_space<vmem>>, %arg10: memref<8x4xf32, #tpu.memory_space<vmem>>, %arg11: memref<8x4xf32, #tpu.memory_space<vmem>>) attributes {dimension_semantics = [#tpu.dimension_semantics<parallel>], iteration_bounds = array<i64: 1>, scalar_prefetch = 0 : i64, scratch_operands = 0 : i64, tpu.core_type = #tpu.core_type<tc>, window_params = [{transform_indices = @transform_0, window_bounds = array<i64: 8, 24>}, {pipeline_mode = #tpu.pipeline_mode<synchronous>, transform_indices = @transform_1, window_bounds = array<i64: 24, 128>}, {pipeline_mode = #tpu.pipeline_mode<synchronous>, transform_indices = @transform_2, window_bounds = array<i64: 1, 128>}, {pipeline_mode = #tpu.pipeline_mode<synchronous>, transform_indices = @transform_3, window_bounds = array<i64: 128, 128>}, {pipeline_mode = #tpu.pipeline_mode<synchronous>, transform_indices = @transform_4, window_bounds = array<i64: 1, 128>}, {pipeline_mode = #tpu.pipeline_mode<synchronous>, transform_indices = @transform_5, window_bounds = array<i64: 128, 4>}, {pipeline_mode = #tpu.pipeline_mode<synchronous>, transform_indices = @transform_6, window_bounds = array<i64: 1, 4>}, {pipeline_mode = #tpu.pipeline_mode<synchronous>, transform_indices = @transform_7, window_bounds = array<i64: 128, 4>}, {pipeline_mode = #tpu.pipeline_mode<synchronous>, transform_indices = @transform_8, window_bounds = array<i64: 1, 4>}, {transform_indices = @transform_9, window_bounds = array<i64: 8, 4>}, {transform_indices = @transform_10, window_bounds = array<i64: 8, 4>}]} {
    %c0 = arith.constant 0 : index
    %c0_0 = arith.constant 0 : index
    %0 = vector.load %arg1[%c0, %c0_0] : memref<8x24xf32, #tpu.memory_space<vmem>>, vector<8x24xf32>
    %c0_1 = arith.constant 0 : index
    %c0_2 = arith.constant 0 : index
    %1 = vector.load %arg2[%c0_1, %c0_2] : memref<24x128xf32, #tpu.memory_space<vmem>>, vector<24x128xf32>
    %cst = arith.constant dense<0.000000e+00> : vector<8x128xf32>
    %2 = tpu.matmul %0, %1, %cst {dimension_numbers = #tpu.dot_dimension_numbers<[1], [0], [0], [1], [0, 0, 1, 1], [], []>} : vector<8x24xf32>, vector<24x128xf32>, vector<8x128xf32> -> vector<8x128xf32>
    %c0_3 = arith.constant 0 : index
    %c0_4 = arith.constant 0 : index
    %3 = vector.load %arg3[%c0_3, %c0_4] : memref<1x128xf32, #tpu.memory_space<vmem>>, vector<1x128xf32>
    %4 = vector.broadcast %3 : vector<1x128xf32> to vector<8x128xf32>
    %5 = arith.addf %2, %4 : vector<8x128xf32>
    %cst_5 = arith.constant 0.000000e+00 : f32
    %6 = vector.broadcast %cst_5 : f32 to vector<8x128xf32>
    %7 = arith.maximumf %5, %6 : vector<8x128xf32>
    %c0_6 = arith.constant 0 : index
    %c0_7 = arith.constant 0 : index
    %8 = vector.load %arg4[%c0_6, %c0_7] : memref<128x128xf32, #tpu.memory_space<vmem>>, vector<128x128xf32>
    %cst_8 = arith.constant dense<0.000000e+00> : vector<8x128xf32>
    %9 = tpu.matmul %7, %8, %cst_8 {dimension_numbers = #tpu.dot_dimension_numbers<[1], [0], [0], [1], [0, 0, 1, 1], [], []>} : vector<8x128xf32>, vector<128x128xf32>, vector<8x128xf32> -> vector<8x128xf32>
    %c0_9 = arith.constant 0 : index
    %c0_10 = arith.constant 0 : index
    %10 = vector.load %arg5[%c0_9, %c0_10] : memref<1x128xf32, #tpu.memory_space<vmem>>, vector<1x128xf32>
    %11 = vector.broadcast %10 : vector<1x128xf32> to vector<8x128xf32>
    %12 = arith.addf %9, %11 : vector<8x128xf32>
    %cst_11 = arith.constant 0.000000e+00 : f32
    %13 = vector.broadcast %cst_11 : f32 to vector<8x128xf32>
    %14 = arith.maximumf %12, %13 : vector<8x128xf32>
    %c0_12 = arith.constant 0 : index
    %c0_13 = arith.constant 0 : index
    %15 = vector.load %arg6[%c0_12, %c0_13] : memref<128x4xf32, #tpu.memory_space<vmem>>, vector<128x4xf32>
    %cst_14 = arith.constant dense<0.000000e+00> : vector<8x4xf32>
    %16 = tpu.matmul %14, %15, %cst_14 {dimension_numbers = #tpu.dot_dimension_numbers<[1], [0], [0], [1], [0, 0, 1, 1], [], []>} : vector<8x128xf32>, vector<128x4xf32>, vector<8x4xf32> -> vector<8x4xf32>
    %c0_15 = arith.constant 0 : index
    %c0_16 = arith.constant 0 : index
    %17 = vector.load %arg7[%c0_15, %c0_16] : memref<1x4xf32, #tpu.memory_space<vmem>>, vector<1x4xf32>
    %18 = vector.broadcast %17 : vector<1x4xf32> to vector<8x4xf32>
    %19 = arith.addf %16, %18 : vector<8x4xf32>
    %c0_17 = arith.constant 0 : index
    %c0_18 = arith.constant 0 : index
    %20 = vector.load %arg8[%c0_17, %c0_18] : memref<128x4xf32, #tpu.memory_space<vmem>>, vector<128x4xf32>
    %cst_19 = arith.constant dense<0.000000e+00> : vector<8x4xf32>
    %21 = tpu.matmul %14, %20, %cst_19 {dimension_numbers = #tpu.dot_dimension_numbers<[1], [0], [0], [1], [0, 0, 1, 1], [], []>} : vector<8x128xf32>, vector<128x4xf32>, vector<8x4xf32> -> vector<8x4xf32>
    %c0_20 = arith.constant 0 : index
    %c0_21 = arith.constant 0 : index
    %22 = vector.load %arg9[%c0_20, %c0_21] : memref<1x4xf32, #tpu.memory_space<vmem>>, vector<1x4xf32>
    %23 = vector.broadcast %22 : vector<1x4xf32> to vector<8x4xf32>
    %24 = arith.addf %21, %23 : vector<8x4xf32>
    %c0_22 = arith.constant 0 : index
    %c0_23 = arith.constant 0 : index
    %25 = vector.load %arg10[%c0_22, %c0_23] : memref<8x4xf32, #tpu.memory_space<vmem>>, vector<8x4xf32>
    tpu.vector_store %arg10[%c0_22, %c0_23], %19 {strides = array<i32>} : memref<8x4xf32, #tpu.memory_space<vmem>>, vector<8x4xf32>,
    %cst_24 = arith.constant -2.000000e+01 : f32
    %cst_25 = arith.constant 2.000000e+00 : f32
    %26 = vector.broadcast %cst_24 : f32 to vector<8x4xf32>
    %27 = arith.maximumf %26, %24 : vector<8x4xf32>
    %28 = vector.broadcast %cst_25 : f32 to vector<8x4xf32>
    %29 = arith.minimumf %28, %27 : vector<8x4xf32>
    %c0_26 = arith.constant 0 : index
    %c0_27 = arith.constant 0 : index
    %30 = vector.load %arg11[%c0_26, %c0_27] : memref<8x4xf32, #tpu.memory_space<vmem>>, vector<8x4xf32>
    tpu.vector_store %arg11[%c0_26, %c0_27], %29 {strides = array<i32>} : memref<8x4xf32, #tpu.memory_space<vmem>>, vector<8x4xf32>,
    return
  }
  func.func @transform_0(%arg0: i32) -> (i32, i32) {
    %c0_i32 = arith.constant 0 : i32
    %c0_i32_0 = arith.constant 0 : i32
    return %arg0, %c0_i32 : i32, i32
  }
  func.func @transform_1(%arg0: i32) -> (i32, i32) {
    %c0_i32 = arith.constant 0 : i32
    %c0_i32_0 = arith.constant 0 : i32
    %c0_i32_1 = arith.constant 0 : i32
    return %c0_i32, %c0_i32_0 : i32, i32
  }
  func.func @transform_2(%arg0: i32) -> (i32, i32) {
    %c0_i32 = arith.constant 0 : i32
    %c0_i32_0 = arith.constant 0 : i32
    %c0_i32_1 = arith.constant 0 : i32
    return %c0_i32, %c0_i32_0 : i32, i32
  }
  func.func @transform_3(%arg0: i32) -> (i32, i32) {
    %c0_i32 = arith.constant 0 : i32
    %c0_i32_0 = arith.constant 0 : i32
    %c0_i32_1 = arith.constant 0 : i32
    return %c0_i32, %c0_i32_0 : i32, i32
  }
  func.func @transform_4(%arg0: i32) -> (i32, i32) {
    %c0_i32 = arith.constant 0 : i32
    %c0_i32_0 = arith.constant 0 : i32
    %c0_i32_1 = arith.constant 0 : i32
    return %c0_i32, %c0_i32_0 : i32, i32
  }
  func.func @transform_5(%arg0: i32) -> (i32, i32) {
    %c0_i32 = arith.constant 0 : i32
    %c0_i32_0 = arith.constant 0 : i32
    %c0_i32_1 = arith.constant 0 : i32
    return %c0_i32, %c0_i32_0 : i32, i32
  }
  func.func @transform_6(%arg0: i32) -> (i32, i32) {
    %c0_i32 = arith.constant 0 : i32
    %c0_i32_0 = arith.constant 0 : i32
    %c0_i32_1 = arith.constant 0 : i32
    return %c0_i32, %c0_i32_0 : i32, i32
  }
  func.func @transform_7(%arg0: i32) -> (i32, i32) {
    %c0_i32 = arith.constant 0 : i32
    %c0_i32_0 = arith.constant 0 : i32
    %c0_i32_1 = arith.constant 0 : i32
    return %c0_i32, %c0_i32_0 : i32, i32
  }
  func.func @transform_8(%arg0: i32) -> (i32, i32) {
    %c0_i32 = arith.constant 0 : i32
    %c0_i32_0 = arith.constant 0 : i32
    %c0_i32_1 = arith.constant 0 : i32
    return %c0_i32, %c0_i32_0 : i32, i32
  }
  func.func @transform_9(%arg0: i32) -> (i32, i32) {
    %c0_i32 = arith.constant 0 : i32
    %c0_i32_0 = arith.constant 0 : i32
    return %arg0, %c0_i32 : i32, i32
  }
  func.func @transform_10(%arg0: i32) -> (i32, i32) {
    %c0_i32 = arith.constant 0 : i32
    %c0_i32_0 = arith.constant 0 : i32
    return %arg0, %c0_i32 : i32, i32
  }
}

</mosaic_0001>

<bundles_post_ra>
// kernel: policy_forward.1
= control target key start
LH: loop header
LB: loop body
LE: loop exit
PB: predicated region body
PF: predicated region fallthrough
CT: control target
= control target key end

     0   :  { %v665_v0 = vmov 0.0|0.0   ;;  %vm666_vm0 = vmmov 0   ;;  %v667_v3 = vmov 0.0   ;;  %vm45_vm1 = vcmask 195584   ;;  %s931_s1 = inlined_call_operand.vmem [shape: f32[24,128], index: 1, kind: input, shape index: {}]   ;;  %s932_s3 = inlined_call_operand.vmem [shape: f32[128,128], index: 3, kind: input, shape index: {}]   ;;  %s933_s0 = inlined_call_operand.vmem [shape: f32[8,24], index: 0, kind: input, shape index: {}]   ;;  %s934_s5 = inlined_call_operand.vmem [shape: f32[128,4], index: 5, kind: input, shape index: {}]   ;;  %s935_s2 = inlined_call_operand.vmem [shape: f32[1,128], index: 2, kind: input, shape index: {}]   ;;  %s936_s7 = inlined_call_operand.vmem [shape: f32[128,4], index: 7, kind: input, shape index: {}]   ;;  %s937_s4 = inlined_call_operand.vmem [shape: f32[1,128], index: 4, kind: input, shape index: {}]   ;;  %s938_s6 = inlined_call_operand.vmem [shape: f32[1,4], index: 6, kind: input, shape index: {}]   ;;  %s939_s8 = inlined_call_operand.vmem [shape: f32[1,4], index: 8, kind: input, shape index: {}]   ;;  %s940_s9 = inlined_call_operand.vmem [shape: f32[8,4], index: 9, kind: output, shape index: {0}]   ;;  %s941_s10 = inlined_call_operand.vmem [shape: f32[8,4], index: 10, kind: output, shape index: {1}]  }
   0x1   :  { %587 = vmatprep.subr.bf16.mxu0 %v665_v0  ;;  %v35_v1 = vld [vmem:[%s931_s1] sm:$0xff]  ;;  %v36_v2 = vld [vmem:[%s931_s1 + $0x8] sm:$0xff]  ;;  %479 = vmatprep.mubr.msk.f32.mxu0 %vm666_vm0, %v667_v3  ;;  %v122_v8 = vld [vmem:[%s932_s3 + $0x10] sm:$0xff]  ;;  %vm400_vm2 = vcmask 31744  }
   0x2   :  { %v588_v4 = vpack.c.bf16 %v36_v2, %v35_v1  ;;  %590 = vmatprep.subr.bf16.mxu1 %v665_v0  ;;  %v120_v5 = vld [vmem:[%s932_s3] sm:$0xff]  ;;  %v121_v6 = vld [vmem:[%s932_s3 + $0x8] sm:$0xff]  ;;  %514 = vmatprep.mubr.msk.f32.mxu1 %vm666_vm0, %v667_v3  ;;  %v123_v9 = vld [vmem:[%s932_s3 + $0x18] sm:$0xff] }
   0x3   :  { %v591_v7 = vpack.c.bf16 %v121_v6, %v120_v5  ;;  %v37_v10 = vld [vmem:[%s931_s1 + $0x10] sm:$0xff]  ;;  %v594_v11 = vpack.c.bf16 %v123_v9, %v122_v8  ;;  %v34_v12 = vld [vmem:[%s933_s0] sm:$0xff]  ;;  %v125_v14 = vld [vmem:[%s932_s3 + $0x28] sm:$0xff] }
   0x4   :  { %589 = vmatpush3.bf16.msra.mxu0 %v588_v4  ;;  %v124_v13 = vld [vmem:[%s932_s3 + $0x20] sm:$0xff]  ;;  %v126_v16 = vld [vmem:[%s932_s3 + $0x30] sm:$0xff]  ;;  %v127_v17 = vld [vmem:[%s932_s3 + $0x38] sm:$0xff] }
   0x5   :  { %477 = vmatprep.subr.mxu0 %v667_v3  ;;  %592 = vmatpush3.bf16.msra.mxu1 %v591_v7  ;;  %v597_v15 = vpack.c.bf16 %v125_v14, %v124_v13  ;;  %v600_v18 = vpack.c.bf16 %v127_v17, %v126_v16  ;;  %v128_v19 = vld [vmem:[%s932_s3 + $0x40] sm:$0xff]  ;;  %v129_v20 = vld [vmem:[%s932_s3 + $0x48] sm:$0xff]  ;;  %v130_v22 = vld [vmem:[%s932_s3 + $0x50] sm:$0xff] }
   0x6   :  { %593 = vmatprep.subr.bf16.mxu1 %v665_v0  ;;  %v603_v21 = vpack.c.bf16 %v129_v20, %v128_v19  ;;  %v131_v23 = vld [vmem:[%s932_s3 + $0x58] sm:$0xff]  ;;  %v132_v25 = vld [vmem:[%s932_s3 + $0x60] sm:$0xff]  ;;  %v133_v26 = vld [vmem:[%s932_s3 + $0x68] sm:$0xff] }
   0x7   :  { %v606_v24 = vpack.c.bf16 %v131_v23, %v130_v22  ;;  %v609_v27 = vpack.c.bf16 %v133_v26, %v132_v25  ;;  %v134_v28 = vld [vmem:[%s932_s3 + $0x70] sm:$0xff]  ;;  %v135_v29 = vld [vmem:[%s932_s3 + $0x78] sm:$0xff]  ;;  %v214_v31 = vld [vmem:[%s934_s5] sm:$0xff] }
   0x8   :  { %478 = vmatpush3.msra.mxu0 %v37_v10  ;;  %v612_v30 = vpack.c.bf16 %v135_v29, %v134_v28  ;;  %v215_v32 = vld [vmem:[%s934_s5 + $0x8] sm:$0xff]  ;;  %v216_v34 = vld [vmem:[%s934_s5 + $0x10] sm:$0xff]  ;;  %v217_v35 = vld [vmem:[%s934_s5 + $0x18] sm:$0xff] }
   0x9   :  { %480 = vmatmul.mubr.msk.f32.vlgmr.msra.gmra.mrb[0].mxu0 %vm45_vm1, %v34_v12  ;;  %595 = vmatpush3.bf16.msra.mxu1 %v594_v11  ;;  %v615_v33 = vpack.c.bf16 %v215_v32, %v214_v31  ;;  %v618_v36 = vpack.c.bf16 %v217_v35, %v216_v34  ;;  %v218_v37 = vld [vmem:[%s934_s5 + $0x20] sm:$0xff]  ;;  %v219_v38 = vld [vmem:[%s934_s5 + $0x28] sm:$0xff]  ;;  %v220_v40 = vld [vmem:[%s934_s5 + $0x30] sm:$0xff] }
   0xa   :  { %596 = vmatprep.subr.bf16.mxu1 %v665_v0  ;;  %614 = vmatprep.subr.bf16.mxu0 %v665_v0  ;;  %v621_v39 = vpack.c.bf16 %v219_v38, %v218_v37  ;;  %v221_v41 = vld [vmem:[%s934_s5 + $0x38] sm:$0xff]  ;;  %v222_v43 = vld [vmem:[%s934_s5 + $0x40] sm:$0xff]  ;;  %v223_v44 = vld [vmem:[%s934_s5 + $0x48] sm:$0xff] }
   0xb   :  { %549 = vmatprep.mubr.msk.f32.mxu0 %vm666_vm0, %v667_v3  ;;  %616 = vmatpush3.bf16.msra.mxu0 %v615_v33  ;;  %v624_v42 = vpack.c.bf16 %v221_v41, %v220_v40  ;;  %v627_v45 = vpack.c.bf16 %v223_v44, %v222_v43  ;;  %v224_v46 = vld [vmem:[%s934_s5 + $0x50] sm:$0xff]  ;;  %v225_v47 = vld [vmem:[%s934_s5 + $0x58] sm:$0xff]  ;;  %v226_v49 = vld [vmem:[%s934_s5 + $0x60] sm:$0xff] }
   0xc   :  { %617 = vmatprep.subr.bf16.mxu0 %v665_v0  ;;  %v630_v48 = vpack.c.bf16 %v225_v47, %v224_v46  ;;  %v227_v50 = vld [vmem:[%s934_s5 + $0x68] sm:$0xff]  ;;  %v413_v52 = vld [vmem:[%s935_s2] ss:$0 sm:$0xff]  ;;  %v309_v60 = vld [vmem:[%s936_s7 + $0x10] sm:$0xff] }
   0xd   :  { %598 = vmatpush3.bf16.msra.mxu1 %v597_v15  ;;  %v633_v51 = vpack.c.bf16 %v227_v50, %v226_v49  ;;  %v307_v53 = vld [vmem:[%s936_s7] sm:$0xff]  ;;  %v308_v54 = vld [vmem:[%s936_s7 + $0x8] sm:$0xff]  ;;  %v310_v61 = vld [vmem:[%s936_s7 + $0x18] sm:$0xff] }
   0xe   :  { %599 = vmatprep.subr.bf16.mxu1 %v665_v0  ;;  %v639_v58 = vpack.c.bf16 %v308_v54, %v307_v53  ;;  %v642_v62 = vpack.c.bf16 %v310_v61, %v309_v60  ;;  %v311_v63 = vld [vmem:[%s936_s7 + $0x20] sm:$0xff]  ;;  %v312_v1 = vld [vmem:[%s936_s7 + $0x28] sm:$0xff]  ;;  %v313_v4 = vld [vmem:[%s936_s7 + $0x30] sm:$0xff] }
   0xf   :  { %619 = vmatpush3.bf16.msra.mxu0 %v618_v36  ;;  %v645_v2 = vpack.c.bf16 %v312_v1, %v311_v63  ;;  %v315_v6 = vld [vmem:[%s936_s7 + $0x40] sm:$0xff]  ;;  %v316_v7 = vld [vmem:[%s936_s7 + $0x48] sm:$0xff]  ;;  %v317_v9 = vld [vmem:[%s936_s7 + $0x50] sm:$0xff] }
  0x10   :  { %620 = vmatprep.subr.bf16.mxu0 %v665_v0  ;;  %v651_v8 = vpack.c.bf16 %v316_v7, %v315_v6  ;;  %v318_v10 = vld [vmem:[%s936_s7 + $0x58] sm:$0xff]  ;;  %v319_v12 = vld [vmem:[%s936_s7 + $0x60] sm:$0xff]  ;;  %v320_v13 = vld [vmem:[%s936_s7 + $0x68] sm:$0xff] }
  0x11   :  { %601 = vmatpush3.bf16.msra.mxu1 %v600_v18  ;;  %v654_v11 = vpack.c.bf16 %v318_v10, %v317_v9  ;;  %v657_v14 = vpack.c.bf16 %v320_v13, %v319_v12  ;;  %v228_v15 = vld [vmem:[%s934_s5 + $0x70] sm:$0xff]  ;;  %v229_v16 = vld [vmem:[%s934_s5 + $0x78] sm:$0xff]  ;;  %v416_v25 = vld [vmem:[%s938_s6] ss:$0 sm:$0xff] }
  0x12   :  { %602 = vmatprep.subr.bf16.mxu1 %v665_v0  ;;  %v321_v17 = vld [vmem:[%s936_s7 + $0x70] sm:$0xff]  ;;  %v636_v18 = vpack.c.bf16 %v229_v16, %v228_v15  ;;  %v322_v19 = vld [vmem:[%s936_s7 + $0x78] sm:$0xff]  ;;  %v417_v26 = vld [vmem:[%s939_s8] ss:$0 sm:$0xff] }
  0x13   :  { %622 = vmatpush3.bf16.msra.mxu0 %v621_v39  ;;  %v660_v20 = vpack.c.bf16 %v322_v19, %v321_v17 }
  0x14   :  { %623 = vmatprep.subr.bf16.mxu0 %v665_v0 }
  0x15   :  { %604 = vmatpush3.bf16.msra.mxu1 %v603_v21 }
  0x16   :  { %605 = vmatprep.subr.bf16.mxu1 %v665_v0 }
  0x17   :  { %625 = vmatpush3.bf16.msra.mxu0 %v624_v42 }
  0x18   :  { %626 = vmatprep.subr.bf16.mxu0 %v665_v0 }
  0x19   :  { %607 = vmatpush3.bf16.msra.mxu1 %v606_v24 }
  0x1a   :  { %608 = vmatprep.subr.bf16.mxu1 %v665_v0 }
  0x1b   :  { %628 = vmatpush3.bf16.msra.mxu0 %v627_v45 }
  0x1c   :  { %629 = vmatprep.subr.bf16.mxu0 %v665_v0 }
  0x1d   :  { %610 = vmatpush3.bf16.msra.mxu1 %v609_v27 }
  0x1e   :  { %611 = vmatprep.subr.bf16.mxu1 %v665_v0 }
  0x1f   :  { %631 = vmatpush3.bf16.msra.mxu0 %v630_v48 }
  0x20   :  { %632 = vmatprep.subr.bf16.mxu0 %v665_v0 }
  0x21   :  { %613 = vmatpush3.bf16.msra.mxu1 %v612_v30 }
  0x22   :  { %638 = vmatprep.subr.bf16.mxu1 %v665_v0 }
  0x23   :  { %634 = vmatpush3.bf16.msra.mxu0 %v633_v51 }
  0x24   :  { %635 = vmatprep.subr.bf16.mxu0 %v665_v0 }
  0x27   :  { %637 = vmatpush3.bf16.msra.mxu0 %v636_v18 }
  0xdc   :  { %v115_v55 = vpop.f32.mrb[0].mxu0 }
  0xdd   :  { %v116_v56 = vadd.f32 %v413_v52, %v115_v55  ;;  %v481_v57 = vpop.f32.mrb[1].mxu0 }
  0xdf   :  { %v119_v59 = vmax.f32 %v116_v56, 0.0 }
  0xe1   :  { %515 = vmatmul.mubr.f32.vlgmr.msra.gmra.mrb[0].mxu1 %v119_v59 }
  0xe2   :  { %640 = vmatpush3.bf16.msra.mxu1 %v639_v58  ;;  %584 = vmatprep.mubr.msk.f32.mxu1 %vm666_vm0, %v667_v3  ;;  %v314_v3 = vld [vmem:[%s936_s7 + $0x38] sm:$0xff] }
  0xe3   :  { %641 = vmatprep.subr.bf16.mxu1 %v665_v0  ;;  %v648_v5 = vpack.c.bf16 %v314_v3, %v313_v4 }
  0xe6   :  { %643 = vmatpush3.bf16.msra.mxu1 %v642_v62 }
  0xe7   :  { %644 = vmatprep.subr.bf16.mxu1 %v665_v0 }
  0xea   :  { %646 = vmatpush3.bf16.msra.mxu1 %v645_v2 }
  0xeb   :  { %647 = vmatprep.subr.bf16.mxu1 %v665_v0 }
  0xee   :  { %649 = vmatpush3.bf16.msra.mxu1 %v648_v5 }
  0xef   :  { %650 = vmatprep.subr.bf16.mxu1 %v665_v0 }
  0xf2   :  { %652 = vmatpush3.bf16.msra.mxu1 %v651_v8 }
  0xf3   :  { %653 = vmatprep.subr.bf16.mxu1 %v665_v0 }
  0xf6   :  { %655 = vmatpush3.bf16.msra.mxu1 %v654_v11 }
  0xf7   :  { %656 = vmatprep.subr.bf16.mxu1 %v665_v0 }
  0xfa   :  { %658 = vmatpush3.bf16.msra.mxu1 %v657_v14 }
  0xfb   :  { %659 = vmatprep.subr.bf16.mxu1 %v665_v0  ;;  %v415_v0 = vld [vmem:[%s937_s4] ss:$0 sm:$0xff] }
  0xfe   :  { %661 = vmatpush3.bf16.msra.mxu1 %v660_v20 }
 0x1b4   :  { %v209_v21 = vpop.f32.mrb[0].mxu1 }
 0x1b5   :  { %v210_v22 = vadd.f32 %v415_v0, %v209_v21  ;;  %v516_v23 = vpop.f32.mrb[1].mxu1 }
 0x1b7   :  { %v213_v24 = vmax.f32 %v210_v22, 0.0 }
 0x1b9   :  { %550 = vmatmul.mubr.f32.vlgmr.msra.gmra.mrb[2].mxu0 %v213_v24  ;;  %585 = vmatmul.mubr.f32.vlgmr.msra.gmra.mrb[2].mxu1 %v213_v24 }
 0x28c   :  { %v303_v27 = vpop.f32.mrb[2].mxu0  ;;  %v396_v28 = vpop.f32.mrb[2].mxu1 }
 0x28d   :  { %v304_v29 = vadd.f32 %v416_v25, %v303_v27  ;;  %v397_v30 = vadd.f32 %v417_v26, %v396_v28  ;;  %v551_v31 = vpop.f32.mrb[3].mxu0  ;;  %v586_v32 = vpop.f32.mrb[3].mxu1 }
 0x28f   :  { %401 = vst.msk [vmem:[%s940_s9] sm:$0xff] %vm400_vm2, %v304_v29  ;;  %v402_v33 = vmax.f32 %v397_v30, -20.0 }
 0x291   :  { %v403_v34 = vmin.f32 %v402_v33, 2.0 }
 0x293   :  { %404 = vst.msk [vmem:[%s941_s10] sm:$0xff] %vm400_vm2, %v403_v34 }

</bundles_post_ra>
